<compile_context>
chip_gen: v7x
topology: tpu7x:2x2x1
jax: 0.10.0
libtpu: 0.0.40
codegen_flags: <defaults>
</compile_context>

<pallas_src>
import jax
import jax.numpy as jnp
from jax.experimental import pallas as pl
from jax.experimental.pallas import tpu as pltpu

_BB = 8  # batch rows per grid block (one full sublane group)


def dip_l_kernel(x_ref, w_ih_ref, w_hh_ref, lin_w_ref, sp_ref, out_ref):
    # x_ref:    (T*BB, D)  time-major input for this batch block (BB rows/step)
    # w_ih_ref: (D, 3H)    GRU input weights (transposed, gate order r,z,n)
    # w_hh_ref: (H, 3H)    GRU hidden weights (transposed)
    # lin_w_ref:(2H, O)    linear1 weight (transposed)
    # sp_ref:   (8, W)     packed small params:
    #                        row0 = b_ih + [b_hh_r, b_hh_z, 0]   (3H)
    #                        row1 = b_hh_n (H), row2 = att_w (H),
    #                        row3[0] = att_b, row4 = lin_b (O)
    # out_ref:  (BB, O)
    BB, O = out_ref.shape
    H = w_hh_ref.shape[0]
    T = x_ref.shape[0] // BB

    sp = sp_ref[...]
    b_fused = sp[0:1, :3 * H]          # (1, 3H)
    b_hh_n = sp[1:2, :H]               # (1, H)
    att_w = sp[2:3, :H]                # (1, H)
    att_b = sp[3:4, 0:1]               # (1, 1)
    lin_b = sp[4:5, :O]                # (1, O)

    w_hh = w_hh_ref[...]               # (H, 3H)

    # Hoisted input projection: one batched matmul off the serial chain.
    gi_all = jnp.dot(x_ref[...], w_ih_ref[...],
                     preferred_element_type=jnp.float32) + b_fused   # (T*BB, 3H)

    # Fully unrolled recurrence; only h @ w_hh is on the serial dependency
    # chain. All state (h, m, l, acc) lives in registers — no VMEM scratch.
    h = None
    m = l = acc = None
    for t in range(T):
        gi = gi_all[t * BB:(t + 1) * BB, :]                          # (BB, 3H)
        if t == 0:
            # h0 == 0 -> gh == 0; skip the matmul entirely on step 0.
            rz = jax.nn.sigmoid(gi[:, :2 * H])
            r = rz[:, :H]
            z = rz[:, H:]
            n = jnp.tanh(gi[:, 2 * H:] + r * b_hh_n)
            h = (1.0 - z) * n
        else:
            gh = jnp.dot(h, w_hh, preferred_element_type=jnp.float32)  # (BB, 3H)
            rz = jax.nn.sigmoid(gi[:, :2 * H] + gh[:, :2 * H])
            r = rz[:, :H]
            z = rz[:, H:]
            n = jnp.tanh(gi[:, 2 * H:] + r * (gh[:, 2 * H:] + b_hh_n))
            h = (1.0 - z) * n + z * h

        # Online softmax over attention steps 0..T-2 (cheap VPU/EUP filler
        # that hides under the next step's MXU wait).
        if t < T - 1:
            logit = jnp.sum(h * att_w, axis=-1, keepdims=True) + att_b  # (BB, 1)
            if t == 0:
                m = logit
                l = jnp.ones_like(logit)
                acc = h
            else:
                m_new = jnp.maximum(m, logit)
                alpha = jnp.exp(m - m_new)
                p = jnp.exp(logit - m_new)
                l = alpha * l + p
                acc = alpha * acc + p * h
                m = m_new

    if T > 1:
        # Exact divide (epilogue, not on the critical path).
        sum_context = acc / l                                        # (BB, H)
    else:
        # T == 1: PyTorch sums an empty tensor over the time axis -> zeros.
        sum_context = jnp.zeros((BB, H), jnp.float32)

    # Split the final matmul at row H instead of a lane-axis concat.
    y = (jnp.dot(h, lin_w_ref[pl.ds(0, H), :],
                 preferred_element_type=jnp.float32)
         + jnp.dot(sum_context, lin_w_ref[pl.ds(H, H), :],
                   preferred_element_type=jnp.float32)
         + lin_b)
    out_ref[...] = y.astype(out_ref.dtype)


@jax.jit
def dip_l_forward(x, w_ih_t, w_hh_t, b_ih, b_hh, att_w, att_b, lin_w_t, lin_b):
    B, T, D = x.shape
    H = w_hh_t.shape[0]
    O = lin_w_t.shape[1]

    BB = _BB
    B_pad = ((B + BB - 1) // BB) * BB
    nb = B_pad // BB

    # Time-major, batch padded to a multiple of 8 sublanes, then rearranged so
    # each batch block is a contiguous (T*BB, D) slab (no in-kernel reshape).
    xt = jnp.transpose(x, (1, 0, 2)).astype(jnp.float32)              # (T, B, D)
    xt = jnp.pad(xt, ((0, 0), (0, B_pad - B), (0, 0)))                # (T, B_pad, D)
    x_blk = (xt.reshape(T, nb, BB, D)
               .transpose(1, 0, 2, 3)
               .reshape(nb, T * BB, D))                               # (nb, T*BB, D)

    # Fuse biases outside the kernel (one-time XLA ops):
    #   r,z gates: b_ih + b_hh can be summed (both outside the r* term)
    #   n gate   : only b_ih is fused; b_hh_n must stay inside r*(...)
    b_fused = b_ih + jnp.concatenate(
        [b_hh[:, :2 * H], jnp.zeros_like(b_hh[:, 2 * H:])], axis=1)   # (1, 3H)
    b_hh_n = b_hh[:, 2 * H:]                                          # (1, H)

    # Pack the tiny parameter vectors into one aligned (8, W) tile.
    W = max(3 * H, H, O, 1)
    W = ((W + 127) // 128) * 128
    sp = jnp.zeros((8, W), jnp.float32)
    sp = sp.at[0, :3 * H].set(b_fused[0])
    sp = sp.at[1, :H].set(b_hh_n[0])
    sp = sp.at[2, :H].set(att_w[0])
    sp = sp.at[3, 0].set(att_b[0, 0])
    sp = sp.at[4, :O].set(lin_b[0])

    out = pl.pallas_call(
        dip_l_kernel,
        out_shape=jax.ShapeDtypeStruct((B_pad, O), jnp.float32),
        grid=(nb,),
        in_specs=[
            pl.BlockSpec((None, T * BB, D), lambda b: (b, 0, 0)),
            pl.BlockSpec((D, 3 * H), lambda b: (0, 0)),
            pl.BlockSpec((H, 3 * H), lambda b: (0, 0)),
            pl.BlockSpec((2 * H, O), lambda b: (0, 0)),
            pl.BlockSpec((8, W), lambda b: (0, 0)),
        ],
        out_specs=pl.BlockSpec((BB, O), lambda b: (b, 0)),
        compiler_params=pltpu.CompilerParams(
            dimension_semantics=("parallel",)),
    )(x_blk, w_ih_t.astype(jnp.float32), w_hh_t.astype(jnp.float32),
      lin_w_t.astype(jnp.float32), sp)
    return out[:B]


def ref_forward(x, w_ih_t, w_hh_t, b_ih, b_hh, att_w, att_b, lin_w_t, lin_b):
    """Pure-JAX reference for validation (same math as PyTorch forward)."""
    B, T, _ = x.shape
    H = w_hh_t.shape[0]

    def step(h, x_t):
        gi = x_t @ w_ih_t + b_ih
        gh = h @ w_hh_t + b_hh
        r = jax.nn.sigmoid(gi[:, :H] + gh[:, :H])
        z = jax.nn.sigmoid(gi[:, H:2 * H] + gh[:, H:2 * H])
        n = jnp.tanh(gi[:, 2 * H:] + r * gh[:, 2 * H:])
        h_new = (1.0 - z) * n + z * h
        return h_new, h_new

    h0 = jnp.zeros((B, H), jnp.float32)
    _, rnn = jax.lax.scan(step, h0, jnp.transpose(x, (1, 0, 2)))  # (T, B, H)
    rnn = jnp.transpose(rnn, (1, 0, 2))                           # (B, T, H)
    out = rnn[:, :-1, :]
    logits = jnp.sum(out * att_w, axis=-1, keepdims=True) + att_b
    sm = jax.nn.softmax(logits, axis=1)
    sum_context = jnp.sum(sm * out, axis=1)
    concat = jnp.concatenate([rnn[:, -1, :], sum_context], axis=1)
    return concat @ lin_w_t + lin_b


def init_params(key, input_dim, hidden_dim, output_dim):
    """Deterministic init mirroring PyTorch default shapes/ranges."""
    ks = jax.random.split(key, 8)
    kg = 1.0 / jnp.sqrt(hidden_dim)
    ka = 1.0 / jnp.sqrt(hidden_dim)
    kl = 1.0 / jnp.sqrt(2.0 * hidden_dim)
    u = lambda k, shape, b: jax.random.uniform(k, shape, jnp.float32, -b, b)
    # GRU weights, PyTorch gate ordering (r, z, n), pre-transposed
    w_ih_t = u(ks[0], (3 * hidden_dim, input_dim), kg).T          # (D, 3H)
    w_hh_t = u(ks[1], (3 * hidden_dim, hidden_dim), kg).T         # (H, 3H)
    b_ih = u(ks[2], (1, 3 * hidden_dim), kg)
    b_hh = u(ks[3], (1, 3 * hidden_dim), kg)
    # attention_t: Linear(H, 1)
    att_w = u(ks[4], (1, hidden_dim), ka)                         # (1, H)
    att_b = u(ks[5], (1, 1), ka)
    # linear1: Linear(2H, O), pre-transposed
    lin_w_t = u(ks[6], (output_dim, 2 * hidden_dim), kl).T        # (2H, O)
    lin_b = u(ks[7], (1, output_dim), kl)
    return (w_ih_t, w_hh_t, b_ih, b_hh, att_w, att_b, lin_w_t, lin_b)


if __name__ == "__main__":
    # Primary (toy) shape.
    B, T, D, H, O = 2, 8, 16, 32, 4
    key = jax.random.PRNGKey(0)
    kx, kp = jax.random.split(key)
    x = jax.random.normal(kx, (B, T, D), jnp.float32)
    params = init_params(kp, D, H, O)

    out = jax.block_until_ready(dip_l_forward(x, *params))
    ref = ref_forward(x, *params)
    assert out.shape == (B, O)
    assert jnp.allclose(out, ref, atol=1e-3, rtol=1e-3), (
        f"mismatch: max err {jnp.max(jnp.abs(out - ref))}")

    # Non-aligned / non-toy-ish shape (layout-sensitive re-validation).
    B2, T2, D2, H2, O2 = 5, 6, 24, 48, 7
    k2x, k2p = jax.random.split(jax.random.PRNGKey(1))
    x2 = jax.random.normal(k2x, (B2, T2, D2), jnp.float32)
    params2 = init_params(k2p, D2, H2, O2)
    out2 = jax.block_until_ready(dip_l_forward(x2, *params2))
    ref2 = ref_forward(x2, *params2)
    assert out2.shape == (B2, O2)
    assert jnp.allclose(out2, ref2, atol=1e-3, rtol=1e-3), (
        f"mismatch (non-aligned): max err {jnp.max(jnp.abs(out2 - ref2))}")

    print("KERNEL_OK")
</pallas_src>

<mosaic_0001>
module attributes {stable_mosaic.version = 11 : i64} {
  func.func @dip_l_kernel(%arg0: i32, %arg1: memref<1x64x16xf32, #tpu.memory_space<vmem>>, %arg2: memref<16x96xf32, #tpu.memory_space<vmem>>, %arg3: memref<32x96xf32, #tpu.memory_space<vmem>>, %arg4: memref<64x4xf32, #tpu.memory_space<vmem>>, %arg5: memref<8x128xf32, #tpu.memory_space<vmem>>, %arg6: memref<8x4xf32, #tpu.memory_space<vmem>>) attributes {dimension_semantics = [#tpu.dimension_semantics<parallel>], iteration_bounds = array<i64: 1>, scalar_prefetch = 0 : i64, scratch_operands = 0 : i64, tpu.core_type = #tpu.core_type<tc>, window_params = [{transform_indices = @transform_0, window_bounds = array<i64: 1, 64, 16>}, {pipeline_mode = #tpu.pipeline_mode<synchronous>, transform_indices = @transform_1, window_bounds = array<i64: 16, 96>}, {pipeline_mode = #tpu.pipeline_mode<synchronous>, transform_indices = @transform_2, window_bounds = array<i64: 32, 96>}, {pipeline_mode = #tpu.pipeline_mode<synchronous>, transform_indices = @transform_3, window_bounds = array<i64: 64, 4>}, {pipeline_mode = #tpu.pipeline_mode<synchronous>, transform_indices = @transform_4, window_bounds = array<i64: 8, 128>}, {transform_indices = @transform_5, window_bounds = array<i64: 8, 4>}]} {
    %c0 = arith.constant 0 : index
    %c0_0 = arith.constant 0 : index
    %0 = vector.load %arg5[%c0, %c0_0] : memref<8x128xf32, #tpu.memory_space<vmem>>, vector<8x128xf32>
    %1 = vector.extract_strided_slice %0 {offsets = [0, 0], sizes = [1, 96], strides = [1, 1]} : vector<8x128xf32> to vector<1x96xf32>
    %2 = vector.extract_strided_slice %0 {offsets = [1, 0], sizes = [1, 32], strides = [1, 1]} : vector<8x128xf32> to vector<1x32xf32>
    %3 = vector.extract_strided_slice %0 {offsets = [2, 0], sizes = [1, 32], strides = [1, 1]} : vector<8x128xf32> to vector<1x32xf32>
    %4 = vector.extract_strided_slice %0 {offsets = [3, 0], sizes = [1, 1], strides = [1, 1]} : vector<8x128xf32> to vector<1x1xf32>
    %5 = vector.extract_strided_slice %0 {offsets = [4, 0], sizes = [1, 4], strides = [1, 1]} : vector<8x128xf32> to vector<1x4xf32>
    %c0_1 = arith.constant 0 : index
    %c0_2 = arith.constant 0 : index
    %6 = vector.load %arg3[%c0_1, %c0_2] : memref<32x96xf32, #tpu.memory_space<vmem>>, vector<32x96xf32>
    %c0_3 = arith.constant 0 : index
    %c0_4 = arith.constant 0 : index
    %c0_5 = arith.constant 0 : index
    %7 = vector.load %arg1[%c0_3, %c0_4, %c0_5] : memref<1x64x16xf32, #tpu.memory_space<vmem>>, vector<1x64x16xf32>
    %8 = vector.shape_cast %7 : vector<1x64x16xf32> to vector<64x16xf32>
    %c0_6 = arith.constant 0 : index
    %c0_7 = arith.constant 0 : index
    %9 = vector.load %arg2[%c0_6, %c0_7] : memref<16x96xf32, #tpu.memory_space<vmem>>, vector<16x96xf32>
    %cst = arith.constant dense<0.000000e+00> : vector<64x96xf32>
    %10 = tpu.matmul %8, %9, %cst {dimension_numbers = #tpu.dot_dimension_numbers<[1], [0], [0], [1], [0, 0, 1, 1], [], []>} : vector<64x16xf32>, vector<16x96xf32>, vector<64x96xf32> -> vector<64x96xf32>
    %11 = vector.broadcast %1 : vector<1x96xf32> to vector<64x96xf32>
    %12 = arith.addf %10, %11 : vector<64x96xf32>
    %13 = vector.extract_strided_slice %12 {offsets = [0, 0], sizes = [8, 96], strides = [1, 1]} : vector<64x96xf32> to vector<8x96xf32>
    %14 = vector.extract_strided_slice %13 {offsets = [0, 0], sizes = [8, 64], strides = [1, 1]} : vector<8x96xf32> to vector<8x64xf32>
    %15 = arith.negf %14 : vector<8x64xf32>
    %16 = math.exp %15 : vector<8x64xf32>
    %cst_8 = arith.constant 1.000000e+00 : f32
    %17 = vector.broadcast %cst_8 : f32 to vector<8x64xf32>
    %18 = arith.addf %17, %16 : vector<8x64xf32>
    %19 = arith.divf %17, %18 : vector<8x64xf32>
    %20 = vector.extract_strided_slice %19 {offsets = [0, 0], sizes = [8, 32], strides = [1, 1]} : vector<8x64xf32> to vector<8x32xf32>
    %21 = vector.extract_strided_slice %19 {offsets = [0, 32], sizes = [8, 32], strides = [1, 1]} : vector<8x64xf32> to vector<8x32xf32>
    %22 = vector.extract_strided_slice %13 {offsets = [0, 64], sizes = [8, 32], strides = [1, 1]} : vector<8x96xf32> to vector<8x32xf32>
    %23 = vector.broadcast %2 : vector<1x32xf32> to vector<8x32xf32>
    %24 = arith.mulf %20, %23 : vector<8x32xf32>
    %25 = arith.addf %22, %24 : vector<8x32xf32>
    %26 = math.tanh %25 : vector<8x32xf32>
    %cst_9 = arith.constant 1.000000e+00 : f32
    %27 = vector.broadcast %cst_9 : f32 to vector<8x32xf32>
    %28 = arith.subf %27, %21 : vector<8x32xf32>
    %29 = arith.mulf %28, %26 : vector<8x32xf32>
    %30 = vector.broadcast %3 : vector<1x32xf32> to vector<8x32xf32>
    %31 = arith.mulf %29, %30 : vector<8x32xf32>
    %cst_10 = arith.constant dense<0.000000e+00> : vector<8xf32>
    %32 = vector.multi_reduction <add>, %31, %cst_10 [1] : vector<8x32xf32> to vector<8xf32>
    %33 = vector.shape_cast %32 : vector<8xf32> to vector<8x1xf32>
    %34 = vector.broadcast %4 : vector<1x1xf32> to vector<8x1xf32>
    %35 = arith.addf %33, %34 : vector<8x1xf32>
    %cst_11 = arith.constant 1.000000e+00 : f32
    %36 = vector.broadcast %cst_11 : f32 to vector<8x1xf32>
    %37 = vector.extract_strided_slice %12 {offsets = [8, 0], sizes = [8, 96], strides = [1, 1]} : vector<64x96xf32> to vector<8x96xf32>
    %cst_12 = arith.constant dense<0.000000e+00> : vector<8x96xf32>
    %38 = tpu.matmul %29, %6, %cst_12 {dimension_numbers = #tpu.dot_dimension_numbers<[1], [0], [0], [1], [0, 0, 1, 1], [], []>} : vector<8x32xf32>, vector<32x96xf32>, vector<8x96xf32> -> vector<8x96xf32>
    %39 = vector.extract_strided_slice %37 {offsets = [0, 0], sizes = [8, 64], strides = [1, 1]} : vector<8x96xf32> to vector<8x64xf32>
    %40 = vector.extract_strided_slice %38 {offsets = [0, 0], sizes = [8, 64], strides = [1, 1]} : vector<8x96xf32> to vector<8x64xf32>
    %41 = arith.addf %39, %40 : vector<8x64xf32>
    %42 = arith.negf %41 : vector<8x64xf32>
    %43 = math.exp %42 : vector<8x64xf32>
    %cst_13 = arith.constant 1.000000e+00 : f32
    %44 = vector.broadcast %cst_13 : f32 to vector<8x64xf32>
    %45 = arith.addf %44, %43 : vector<8x64xf32>
    %46 = arith.divf %44, %45 : vector<8x64xf32>
    %47 = vector.extract_strided_slice %46 {offsets = [0, 0], sizes = [8, 32], strides = [1, 1]} : vector<8x64xf32> to vector<8x32xf32>
    %48 = vector.extract_strided_slice %46 {offsets = [0, 32], sizes = [8, 32], strides = [1, 1]} : vector<8x64xf32> to vector<8x32xf32>
    %49 = vector.extract_strided_slice %37 {offsets = [0, 64], sizes = [8, 32], strides = [1, 1]} : vector<8x96xf32> to vector<8x32xf32>
    %50 = vector.extract_strided_slice %38 {offsets = [0, 64], sizes = [8, 32], strides = [1, 1]} : vector<8x96xf32> to vector<8x32xf32>
    %51 = vector.broadcast %2 : vector<1x32xf32> to vector<8x32xf32>
    %52 = arith.addf %50, %51 : vector<8x32xf32>
    %53 = arith.mulf %47, %52 : vector<8x32xf32>
    %54 = arith.addf %49, %53 : vector<8x32xf32>
    %55 = math.tanh %54 : vector<8x32xf32>
    %cst_14 = arith.constant 1.000000e+00 : f32
    %56 = vector.broadcast %cst_14 : f32 to vector<8x32xf32>
    %57 = arith.subf %56, %48 : vector<8x32xf32>
    %58 = arith.mulf %57, %55 : vector<8x32xf32>
    %59 = arith.mulf %48, %29 : vector<8x32xf32>
    %60 = arith.addf %58, %59 : vector<8x32xf32>
    %61 = vector.broadcast %3 : vector<1x32xf32> to vector<8x32xf32>
    %62 = arith.mulf %60, %61 : vector<8x32xf32>
    %cst_15 = arith.constant dense<0.000000e+00> : vector<8xf32>
    %63 = vector.multi_reduction <add>, %62, %cst_15 [1] : vector<8x32xf32> to vector<8xf32>
    %64 = vector.shape_cast %63 : vector<8xf32> to vector<8x1xf32>
    %65 = vector.broadcast %4 : vector<1x1xf32> to vector<8x1xf32>
    %66 = arith.addf %64, %65 : vector<8x1xf32>
    %67 = arith.maximumf %35, %66 : vector<8x1xf32>
    %68 = arith.subf %35, %67 : vector<8x1xf32>
    %69 = math.exp %68 : vector<8x1xf32>
    %70 = arith.subf %66, %67 : vector<8x1xf32>
    %71 = math.exp %70 : vector<8x1xf32>
    %72 = arith.mulf %69, %36 : vector<8x1xf32>
    %73 = arith.addf %72, %71 : vector<8x1xf32>
    %74 = vector.broadcast %69 : vector<8x1xf32> to vector<8x32xf32>
    %75 = arith.mulf %74, %29 : vector<8x32xf32>
    %76 = vector.broadcast %71 : vector<8x1xf32> to vector<8x32xf32>
    %77 = arith.mulf %76, %60 : vector<8x32xf32>
    %78 = arith.addf %75, %77 : vector<8x32xf32>
    %79 = vector.extract_strided_slice %12 {offsets = [16, 0], sizes = [8, 96], strides = [1, 1]} : vector<64x96xf32> to vector<8x96xf32>
    %cst_16 = arith.constant dense<0.000000e+00> : vector<8x96xf32>
    %80 = tpu.matmul %60, %6, %cst_16 {dimension_numbers = #tpu.dot_dimension_numbers<[1], [0], [0], [1], [0, 0, 1, 1], [], []>} : vector<8x32xf32>, vector<32x96xf32>, vector<8x96xf32> -> vector<8x96xf32>
    %81 = vector.extract_strided_slice %79 {offsets = [0, 0], sizes = [8, 64], strides = [1, 1]} : vector<8x96xf32> to vector<8x64xf32>
    %82 = vector.extract_strided_slice %80 {offsets = [0, 0], sizes = [8, 64], strides = [1, 1]} : vector<8x96xf32> to vector<8x64xf32>
    %83 = arith.addf %81, %82 : vector<8x64xf32>
    %84 = arith.negf %83 : vector<8x64xf32>
    %85 = math.exp %84 : vector<8x64xf32>
    %cst_17 = arith.constant 1.000000e+00 : f32
    %86 = vector.broadcast %cst_17 : f32 to vector<8x64xf32>
    %87 = arith.addf %86, %85 : vector<8x64xf32>
    %88 = arith.divf %86, %87 : vector<8x64xf32>
    %89 = vector.extract_strided_slice %88 {offsets = [0, 0], sizes = [8, 32], strides = [1, 1]} : vector<8x64xf32> to vector<8x32xf32>
    %90 = vector.extract_strided_slice %88 {offsets = [0, 32], sizes = [8, 32], strides = [1, 1]} : vector<8x64xf32> to vector<8x32xf32>
    %91 = vector.extract_strided_slice %79 {offsets = [0, 64], sizes = [8, 32], strides = [1, 1]} : vector<8x96xf32> to vector<8x32xf32>
    %92 = vector.extract_strided_slice %80 {offsets = [0, 64], sizes = [8, 32], strides = [1, 1]} : vector<8x96xf32> to vector<8x32xf32>
    %93 = vector.broadcast %2 : vector<1x32xf32> to vector<8x32xf32>
    %94 = arith.addf %92, %93 : vector<8x32xf32>
    %95 = arith.mulf %89, %94 : vector<8x32xf32>
    %96 = arith.addf %91, %95 : vector<8x32xf32>
    %97 = math.tanh %96 : vector<8x32xf32>
    %cst_18 = arith.constant 1.000000e+00 : f32
    %98 = vector.broadcast %cst_18 : f32 to vector<8x32xf32>
    %99 = arith.subf %98, %90 : vector<8x32xf32>
    %100 = arith.mulf %99, %97 : vector<8x32xf32>
    %101 = arith.mulf %90, %60 : vector<8x32xf32>
    %102 = arith.addf %100, %101 : vector<8x32xf32>
    %103 = vector.broadcast %3 : vector<1x32xf32> to vector<8x32xf32>
    %104 = arith.mulf %102, %103 : vector<8x32xf32>
    %cst_19 = arith.constant dense<0.000000e+00> : vector<8xf32>
    %105 = vector.multi_reduction <add>, %104, %cst_19 [1] : vector<8x32xf32> to vector<8xf32>
    %106 = vector.shape_cast %105 : vector<8xf32> to vector<8x1xf32>
    %107 = vector.broadcast %4 : vector<1x1xf32> to vector<8x1xf32>
    %108 = arith.addf %106, %107 : vector<8x1xf32>
    %109 = arith.maximumf %67, %108 : vector<8x1xf32>
    %110 = arith.subf %67, %109 : vector<8x1xf32>
    %111 = math.exp %110 : vector<8x1xf32>
    %112 = arith.subf %108, %109 : vector<8x1xf32>
    %113 = math.exp %112 : vector<8x1xf32>
    %114 = arith.mulf %111, %73 : vector<8x1xf32>
    %115 = arith.addf %114, %113 : vector<8x1xf32>
    %116 = vector.broadcast %111 : vector<8x1xf32> to vector<8x32xf32>
    %117 = arith.mulf %116, %78 : vector<8x32xf32>
    %118 = vector.broadcast %113 : vector<8x1xf32> to vector<8x32xf32>
    %119 = arith.mulf %118, %102 : vector<8x32xf32>
    %120 = arith.addf %117, %119 : vector<8x32xf32>
    %121 = vector.extract_strided_slice %12 {offsets = [24, 0], sizes = [8, 96], strides = [1, 1]} : vector<64x96xf32> to vector<8x96xf32>
    %cst_20 = arith.constant dense<0.000000e+00> : vector<8x96xf32>
    %122 = tpu.matmul %102, %6, %cst_20 {dimension_numbers = #tpu.dot_dimension_numbers<[1], [0], [0], [1], [0, 0, 1, 1], [], []>} : vector<8x32xf32>, vector<32x96xf32>, vector<8x96xf32> -> vector<8x96xf32>
    %123 = vector.extract_strided_slice %121 {offsets = [0, 0], sizes = [8, 64], strides = [1, 1]} : vector<8x96xf32> to vector<8x64xf32>
    %124 = vector.extract_strided_slice %122 {offsets = [0, 0], sizes = [8, 64], strides = [1, 1]} : vector<8x96xf32> to vector<8x64xf32>
    %125 = arith.addf %123, %124 : vector<8x64xf32>
    %126 = arith.negf %125 : vector<8x64xf32>
    %127 = math.exp %126 : vector<8x64xf32>
    %cst_21 = arith.constant 1.000000e+00 : f32
    %128 = vector.broadcast %cst_21 : f32 to vector<8x64xf32>
    %129 = arith.addf %128, %127 : vector<8x64xf32>
    %130 = arith.divf %128, %129 : vector<8x64xf32>
    %131 = vector.extract_strided_slice %130 {offsets = [0, 0], sizes = [8, 32], strides = [1, 1]} : vector<8x64xf32> to vector<8x32xf32>
    %132 = vector.extract_strided_slice %130 {offsets = [0, 32], sizes = [8, 32], strides = [1, 1]} : vector<8x64xf32> to vector<8x32xf32>
    %133 = vector.extract_strided_slice %121 {offsets = [0, 64], sizes = [8, 32], strides = [1, 1]} : vector<8x96xf32> to vector<8x32xf32>
    %134 = vector.extract_strided_slice %122 {offsets = [0, 64], sizes = [8, 32], strides = [1, 1]} : vector<8x96xf32> to vector<8x32xf32>
    %135 = vector.broadcast %2 : vector<1x32xf32> to vector<8x32xf32>
    %136 = arith.addf %134, %135 : vector<8x32xf32>
    %137 = arith.mulf %131, %136 : vector<8x32xf32>
    %138 = arith.addf %133, %137 : vector<8x32xf32>
    %139 = math.tanh %138 : vector<8x32xf32>
    %cst_22 = arith.constant 1.000000e+00 : f32
    %140 = vector.broadcast %cst_22 : f32 to vector<8x32xf32>
    %141 = arith.subf %140, %132 : vector<8x32xf32>
    %142 = arith.mulf %141, %139 : vector<8x32xf32>
    %143 = arith.mulf %132, %102 : vector<8x32xf32>
    %144 = arith.addf %142, %143 : vector<8x32xf32>
    %145 = vector.broadcast %3 : vector<1x32xf32> to vector<8x32xf32>
    %146 = arith.mulf %144, %145 : vector<8x32xf32>
    %cst_23 = arith.constant dense<0.000000e+00> : vector<8xf32>
    %147 = vector.multi_reduction <add>, %146, %cst_23 [1] : vector<8x32xf32> to vector<8xf32>
    %148 = vector.shape_cast %147 : vector<8xf32> to vector<8x1xf32>
    %149 = vector.broadcast %4 : vector<1x1xf32> to vector<8x1xf32>
    %150 = arith.addf %148, %149 : vector<8x1xf32>
    %151 = arith.maximumf %109, %150 : vector<8x1xf32>
    %152 = arith.subf %109, %151 : vector<8x1xf32>
    %153 = math.exp %152 : vector<8x1xf32>
    %154 = arith.subf %150, %151 : vector<8x1xf32>
    %155 = math.exp %154 : vector<8x1xf32>
    %156 = arith.mulf %153, %115 : vector<8x1xf32>
    %157 = arith.addf %156, %155 : vector<8x1xf32>
    %158 = vector.broadcast %153 : vector<8x1xf32> to vector<8x32xf32>
    %159 = arith.mulf %158, %120 : vector<8x32xf32>
    %160 = vector.broadcast %155 : vector<8x1xf32> to vector<8x32xf32>
    %161 = arith.mulf %160, %144 : vector<8x32xf32>
    %162 = arith.addf %159, %161 : vector<8x32xf32>
    %163 = vector.extract_strided_slice %12 {offsets = [32, 0], sizes = [8, 96], strides = [1, 1]} : vector<64x96xf32> to vector<8x96xf32>
    %cst_24 = arith.constant dense<0.000000e+00> : vector<8x96xf32>
    %164 = tpu.matmul %144, %6, %cst_24 {dimension_numbers = #tpu.dot_dimension_numbers<[1], [0], [0], [1], [0, 0, 1, 1], [], []>} : vector<8x32xf32>, vector<32x96xf32>, vector<8x96xf32> -> vector<8x96xf32>
    %165 = vector.extract_strided_slice %163 {offsets = [0, 0], sizes = [8, 64], strides = [1, 1]} : vector<8x96xf32> to vector<8x64xf32>
    %166 = vector.extract_strided_slice %164 {offsets = [0, 0], sizes = [8, 64], strides = [1, 1]} : vector<8x96xf32> to vector<8x64xf32>
    %167 = arith.addf %165, %166 : vector<8x64xf32>
    %168 = arith.negf %167 : vector<8x64xf32>
    %169 = math.exp %168 : vector<8x64xf32>
    %cst_25 = arith.constant 1.000000e+00 : f32
    %170 = vector.broadcast %cst_25 : f32 to vector<8x64xf32>
    %171 = arith.addf %170, %169 : vector<8x64xf32>
    %172 = arith.divf %170, %171 : vector<8x64xf32>
    %173 = vector.extract_strided_slice %172 {offsets = [0, 0], sizes = [8, 32], strides = [1, 1]} : vector<8x64xf32> to vector<8x32xf32>
    %174 = vector.extract_strided_slice %172 {offsets = [0, 32], sizes = [8, 32], strides = [1, 1]} : vector<8x64xf32> to vector<8x32xf32>
    %175 = vector.extract_strided_slice %163 {offsets = [0, 64], sizes = [8, 32], strides = [1, 1]} : vector<8x96xf32> to vector<8x32xf32>
    %176 = vector.extract_strided_slice %164 {offsets = [0, 64], sizes = [8, 32], strides = [1, 1]} : vector<8x96xf32> to vector<8x32xf32>
    %177 = vector.broadcast %2 : vector<1x32xf32> to vector<8x32xf32>
    %178 = arith.addf %176, %177 : vector<8x32xf32>
    %179 = arith.mulf %173, %178 : vector<8x32xf32>
    %180 = arith.addf %175, %179 : vector<8x32xf32>
    %181 = math.tanh %180 : vector<8x32xf32>
    %cst_26 = arith.constant 1.000000e+00 : f32
    %182 = vector.broadcast %cst_26 : f32 to vector<8x32xf32>
    %183 = arith.subf %182, %174 : vector<8x32xf32>
    %184 = arith.mulf %183, %181 : vector<8x32xf32>
    %185 = arith.mulf %174, %144 : vector<8x32xf32>
    %186 = arith.addf %184, %185 : vector<8x32xf32>
    %187 = vector.broadcast %3 : vector<1x32xf32> to vector<8x32xf32>
    %188 = arith.mulf %186, %187 : vector<8x32xf32>
    %cst_27 = arith.constant dense<0.000000e+00> : vector<8xf32>
    %189 = vector.multi_reduction <add>, %188, %cst_27 [1] : vector<8x32xf32> to vector<8xf32>
    %190 = vector.shape_cast %189 : vector<8xf32> to vector<8x1xf32>
    %191 = vector.broadcast %4 : vector<1x1xf32> to vector<8x1xf32>
    %192 = arith.addf %190, %191 : vector<8x1xf32>
    %193 = arith.maximumf %151, %192 : vector<8x1xf32>
    %194 = arith.subf %151, %193 : vector<8x1xf32>
    %195 = math.exp %194 : vector<8x1xf32>
    %196 = arith.subf %192, %193 : vector<8x1xf32>
    %197 = math.exp %196 : vector<8x1xf32>
    %198 = arith.mulf %195, %157 : vector<8x1xf32>
    %199 = arith.addf %198, %197 : vector<8x1xf32>
    %200 = vector.broadcast %195 : vector<8x1xf32> to vector<8x32xf32>
    %201 = arith.mulf %200, %162 : vector<8x32xf32>
    %202 = vector.broadcast %197 : vector<8x1xf32> to vector<8x32xf32>
    %203 = arith.mulf %202, %186 : vector<8x32xf32>
    %204 = arith.addf %201, %203 : vector<8x32xf32>
    %205 = vector.extract_strided_slice %12 {offsets = [40, 0], sizes = [8, 96], strides = [1, 1]} : vector<64x96xf32> to vector<8x96xf32>
    %cst_28 = arith.constant dense<0.000000e+00> : vector<8x96xf32>
    %206 = tpu.matmul %186, %6, %cst_28 {dimension_numbers = #tpu.dot_dimension_numbers<[1], [0], [0], [1], [0, 0, 1, 1], [], []>} : vector<8x32xf32>, vector<32x96xf32>, vector<8x96xf32> -> vector<8x96xf32>
    %207 = vector.extract_strided_slice %205 {offsets = [0, 0], sizes = [8, 64], strides = [1, 1]} : vector<8x96xf32> to vector<8x64xf32>
    %208 = vector.extract_strided_slice %206 {offsets = [0, 0], sizes = [8, 64], strides = [1, 1]} : vector<8x96xf32> to vector<8x64xf32>
    %209 = arith.addf %207, %208 : vector<8x64xf32>
    %210 = arith.negf %209 : vector<8x64xf32>
    %211 = math.exp %210 : vector<8x64xf32>
    %cst_29 = arith.constant 1.000000e+00 : f32
    %212 = vector.broadcast %cst_29 : f32 to vector<8x64xf32>
    %213 = arith.addf %212, %211 : vector<8x64xf32>
    %214 = arith.divf %212, %213 : vector<8x64xf32>
    %215 = vector.extract_strided_slice %214 {offsets = [0, 0], sizes = [8, 32], strides = [1, 1]} : vector<8x64xf32> to vector<8x32xf32>
    %216 = vector.extract_strided_slice %214 {offsets = [0, 32], sizes = [8, 32], strides = [1, 1]} : vector<8x64xf32> to vector<8x32xf32>
    %217 = vector.extract_strided_slice %205 {offsets = [0, 64], sizes = [8, 32], strides = [1, 1]} : vector<8x96xf32> to vector<8x32xf32>
    %218 = vector.extract_strided_slice %206 {offsets = [0, 64], sizes = [8, 32], strides = [1, 1]} : vector<8x96xf32> to vector<8x32xf32>
    %219 = vector.broadcast %2 : vector<1x32xf32> to vector<8x32xf32>
    %220 = arith.addf %218, %219 : vector<8x32xf32>
    %221 = arith.mulf %215, %220 : vector<8x32xf32>
    %222 = arith.addf %217, %221 : vector<8x32xf32>
    %223 = math.tanh %222 : vector<8x32xf32>
    %cst_30 = arith.constant 1.000000e+00 : f32
    %224 = vector.broadcast %cst_30 : f32 to vector<8x32xf32>
    %225 = arith.subf %224, %216 : vector<8x32xf32>
    %226 = arith.mulf %225, %223 : vector<8x32xf32>
    %227 = arith.mulf %216, %186 : vector<8x32xf32>
    %228 = arith.addf %226, %227 : vector<8x32xf32>
    %229 = vector.broadcast %3 : vector<1x32xf32> to vector<8x32xf32>
    %230 = arith.mulf %228, %229 : vector<8x32xf32>
    %cst_31 = arith.constant dense<0.000000e+00> : vector<8xf32>
    %231 = vector.multi_reduction <add>, %230, %cst_31 [1] : vector<8x32xf32> to vector<8xf32>
    %232 = vector.shape_cast %231 : vector<8xf32> to vector<8x1xf32>
    %233 = vector.broadcast %4 : vector<1x1xf32> to vector<8x1xf32>
    %234 = arith.addf %232, %233 : vector<8x1xf32>
    %235 = arith.maximumf %193, %234 : vector<8x1xf32>
    %236 = arith.subf %193, %235 : vector<8x1xf32>
    %237 = math.exp %236 : vector<8x1xf32>
    %238 = arith.subf %234, %235 : vector<8x1xf32>
    %239 = math.exp %238 : vector<8x1xf32>
    %240 = arith.mulf %237, %199 : vector<8x1xf32>
    %241 = arith.addf %240, %239 : vector<8x1xf32>
    %242 = vector.broadcast %237 : vector<8x1xf32> to vector<8x32xf32>
    %243 = arith.mulf %242, %204 : vector<8x32xf32>
    %244 = vector.broadcast %239 : vector<8x1xf32> to vector<8x32xf32>
    %245 = arith.mulf %244, %228 : vector<8x32xf32>
    %246 = arith.addf %243, %245 : vector<8x32xf32>
    %247 = vector.extract_strided_slice %12 {offsets = [48, 0], sizes = [8, 96], strides = [1, 1]} : vector<64x96xf32> to vector<8x96xf32>
    %cst_32 = arith.constant dense<0.000000e+00> : vector<8x96xf32>
    %248 = tpu.matmul %228, %6, %cst_32 {dimension_numbers = #tpu.dot_dimension_numbers<[1], [0], [0], [1], [0, 0, 1, 1], [], []>} : vector<8x32xf32>, vector<32x96xf32>, vector<8x96xf32> -> vector<8x96xf32>
    %249 = vector.extract_strided_slice %247 {offsets = [0, 0], sizes = [8, 64], strides = [1, 1]} : vector<8x96xf32> to vector<8x64xf32>
    %250 = vector.extract_strided_slice %248 {offsets = [0, 0], sizes = [8, 64], strides = [1, 1]} : vector<8x96xf32> to vector<8x64xf32>
    %251 = arith.addf %249, %250 : vector<8x64xf32>
    %252 = arith.negf %251 : vector<8x64xf32>
    %253 = math.exp %252 : vector<8x64xf32>
    %cst_33 = arith.constant 1.000000e+00 : f32
    %254 = vector.broadcast %cst_33 : f32 to vector<8x64xf32>
    %255 = arith.addf %254, %253 : vector<8x64xf32>
    %256 = arith.divf %254, %255 : vector<8x64xf32>
    %257 = vector.extract_strided_slice %256 {offsets = [0, 0], sizes = [8, 32], strides = [1, 1]} : vector<8x64xf32> to vector<8x32xf32>
    %258 = vector.extract_strided_slice %256 {offsets = [0, 32], sizes = [8, 32], strides = [1, 1]} : vector<8x64xf32> to vector<8x32xf32>
    %259 = vector.extract_strided_slice %247 {offsets = [0, 64], sizes = [8, 32], strides = [1, 1]} : vector<8x96xf32> to vector<8x32xf32>
    %260 = vector.extract_strided_slice %248 {offsets = [0, 64], sizes = [8, 32], strides = [1, 1]} : vector<8x96xf32> to vector<8x32xf32>
    %261 = vector.broadcast %2 : vector<1x32xf32> to vector<8x32xf32>
    %262 = arith.addf %260, %261 : vector<8x32xf32>
    %263 = arith.mulf %257, %262 : vector<8x32xf32>
    %264 = arith.addf %259, %263 : vector<8x32xf32>
    %265 = math.tanh %264 : vector<8x32xf32>
    %cst_34 = arith.constant 1.000000e+00 : f32
    %266 = vector.broadcast %cst_34 : f32 to vector<8x32xf32>
    %267 = arith.subf %266, %258 : vector<8x32xf32>
    %268 = arith.mulf %267, %265 : vector<8x32xf32>
    %269 = arith.mulf %258, %228 : vector<8x32xf32>
    %270 = arith.addf %268, %269 : vector<8x32xf32>
    %271 = vector.broadcast %3 : vector<1x32xf32> to vector<8x32xf32>
    %272 = arith.mulf %270, %271 : vector<8x32xf32>
    %cst_35 = arith.constant dense<0.000000e+00> : vector<8xf32>
    %273 = vector.multi_reduction <add>, %272, %cst_35 [1] : vector<8x32xf32> to vector<8xf32>
    %274 = vector.shape_cast %273 : vector<8xf32> to vector<8x1xf32>
    %275 = vector.broadcast %4 : vector<1x1xf32> to vector<8x1xf32>
    %276 = arith.addf %274, %275 : vector<8x1xf32>
    %277 = arith.maximumf %235, %276 : vector<8x1xf32>
    %278 = arith.subf %235, %277 : vector<8x1xf32>
    %279 = math.exp %278 : vector<8x1xf32>
    %280 = arith.subf %276, %277 : vector<8x1xf32>
    %281 = math.exp %280 : vector<8x1xf32>
    %282 = arith.mulf %279, %241 : vector<8x1xf32>
    %283 = arith.addf %282, %281 : vector<8x1xf32>
    %284 = vector.broadcast %279 : vector<8x1xf32> to vector<8x32xf32>
    %285 = arith.mulf %284, %246 : vector<8x32xf32>
    %286 = vector.broadcast %281 : vector<8x1xf32> to vector<8x32xf32>
    %287 = arith.mulf %286, %270 : vector<8x32xf32>
    %288 = arith.addf %285, %287 : vector<8x32xf32>
    %289 = vector.extract_strided_slice %12 {offsets = [56, 0], sizes = [8, 96], strides = [1, 1]} : vector<64x96xf32> to vector<8x96xf32>
    %cst_36 = arith.constant dense<0.000000e+00> : vector<8x96xf32>
    %290 = tpu.matmul %270, %6, %cst_36 {dimension_numbers = #tpu.dot_dimension_numbers<[1], [0], [0], [1], [0, 0, 1, 1], [], []>} : vector<8x32xf32>, vector<32x96xf32>, vector<8x96xf32> -> vector<8x96xf32>
    %291 = vector.extract_strided_slice %289 {offsets = [0, 0], sizes = [8, 64], strides = [1, 1]} : vector<8x96xf32> to vector<8x64xf32>
    %292 = vector.extract_strided_slice %290 {offsets = [0, 0], sizes = [8, 64], strides = [1, 1]} : vector<8x96xf32> to vector<8x64xf32>
    %293 = arith.addf %291, %292 : vector<8x64xf32>
    %294 = arith.negf %293 : vector<8x64xf32>
    %295 = math.exp %294 : vector<8x64xf32>
    %cst_37 = arith.constant 1.000000e+00 : f32
    %296 = vector.broadcast %cst_37 : f32 to vector<8x64xf32>
    %297 = arith.addf %296, %295 : vector<8x64xf32>
    %298 = arith.divf %296, %297 : vector<8x64xf32>
    %299 = vector.extract_strided_slice %298 {offsets = [0, 0], sizes = [8, 32], strides = [1, 1]} : vector<8x64xf32> to vector<8x32xf32>
    %300 = vector.extract_strided_slice %298 {offsets = [0, 32], sizes = [8, 32], strides = [1, 1]} : vector<8x64xf32> to vector<8x32xf32>
    %301 = vector.extract_strided_slice %289 {offsets = [0, 64], sizes = [8, 32], strides = [1, 1]} : vector<8x96xf32> to vector<8x32xf32>
    %302 = vector.extract_strided_slice %290 {offsets = [0, 64], sizes = [8, 32], strides = [1, 1]} : vector<8x96xf32> to vector<8x32xf32>
    %303 = vector.broadcast %2 : vector<1x32xf32> to vector<8x32xf32>
    %304 = arith.addf %302, %303 : vector<8x32xf32>
    %305 = arith.mulf %299, %304 : vector<8x32xf32>
    %306 = arith.addf %301, %305 : vector<8x32xf32>
    %307 = math.tanh %306 : vector<8x32xf32>
    %cst_38 = arith.constant 1.000000e+00 : f32
    %308 = vector.broadcast %cst_38 : f32 to vector<8x32xf32>
    %309 = arith.subf %308, %300 : vector<8x32xf32>
    %310 = arith.mulf %309, %307 : vector<8x32xf32>
    %311 = arith.mulf %300, %270 : vector<8x32xf32>
    %312 = arith.addf %310, %311 : vector<8x32xf32>
    %313 = vector.broadcast %283 : vector<8x1xf32> to vector<8x32xf32>
    %314 = arith.divf %288, %313 : vector<8x32xf32>
    %c0_39 = arith.constant 0 : index
    %c0_40 = arith.constant 0 : index
    %315 = vector.load %arg4[%c0_39, %c0_40] : memref<64x4xf32, #tpu.memory_space<vmem>>, vector<32x4xf32>
    %cst_41 = arith.constant dense<0.000000e+00> : vector<8x4xf32>
    %316 = tpu.matmul %312, %315, %cst_41 {dimension_numbers = #tpu.dot_dimension_numbers<[1], [0], [0], [1], [0, 0, 1, 1], [], []>} : vector<8x32xf32>, vector<32x4xf32>, vector<8x4xf32> -> vector<8x4xf32>
    %c32 = arith.constant 32 : index
    %c0_42 = arith.constant 0 : index
    %317 = vector.load %arg4[%c32, %c0_42] : memref<64x4xf32, #tpu.memory_space<vmem>>, vector<32x4xf32>
    %cst_43 = arith.constant dense<0.000000e+00> : vector<8x4xf32>
    %318 = tpu.matmul %314, %317, %cst_43 {dimension_numbers = #tpu.dot_dimension_numbers<[1], [0], [0], [1], [0, 0, 1, 1], [], []>} : vector<8x32xf32>, vector<32x4xf32>, vector<8x4xf32> -> vector<8x4xf32>
    %319 = arith.addf %316, %318 : vector<8x4xf32>
    %320 = vector.broadcast %5 : vector<1x4xf32> to vector<8x4xf32>
    %321 = arith.addf %319, %320 : vector<8x4xf32>
    %c0_44 = arith.constant 0 : index
    %c0_45 = arith.constant 0 : index
    %322 = vector.load %arg6[%c0_44, %c0_45] : memref<8x4xf32, #tpu.memory_space<vmem>>, vector<8x4xf32>
    tpu.vector_store %arg6[%c0_44, %c0_45], %321 {strides = array<i32>} : memref<8x4xf32, #tpu.memory_space<vmem>>, vector<8x4xf32>,
    return
  }
  func.func @transform_0(%arg0: i32) -> (i32, i32, i32) {
    %c0_i32 = arith.constant 0 : i32
    %c0_i32_0 = arith.constant 0 : i32
    %c0_i32_1 = arith.constant 0 : i32
    return %arg0, %c0_i32, %c0_i32_0 : i32, i32, i32
  }
  func.func @transform_1(%arg0: i32) -> (i32, i32) {
    %c0_i32 = arith.constant 0 : i32
    %c0_i32_0 = arith.constant 0 : i32
    %c0_i32_1 = arith.constant 0 : i32
    return %c0_i32, %c0_i32_0 : i32, i32
  }
  func.func @transform_2(%arg0: i32) -> (i32, i32) {
    %c0_i32 = arith.constant 0 : i32
    %c0_i32_0 = arith.constant 0 : i32
    %c0_i32_1 = arith.constant 0 : i32
    return %c0_i32, %c0_i32_0 : i32, i32
  }
  func.func @transform_3(%arg0: i32) -> (i32, i32) {
    %c0_i32 = arith.constant 0 : i32
    %c0_i32_0 = arith.constant 0 : i32
    %c0_i32_1 = arith.constant 0 : i32
    return %c0_i32, %c0_i32_0 : i32, i32
  }
  func.func @transform_4(%arg0: i32) -> (i32, i32) {
    %c0_i32 = arith.constant 0 : i32
    %c0_i32_0 = arith.constant 0 : i32
    %c0_i32_1 = arith.constant 0 : i32
    return %c0_i32, %c0_i32_0 : i32, i32
  }
  func.func @transform_5(%arg0: i32) -> (i32, i32) {
    %c0_i32 = arith.constant 0 : i32
    %c0_i32_0 = arith.constant 0 : i32
    return %arg0, %c0_i32 : i32, i32
  }
}

</mosaic_0001>

<bundles_post_ra>
// kernel: dip_l_forward.1
= control target key start
LH: loop header
LB: loop body
LE: loop exit
PB: predicated region body
PF: predicated region fallthrough
CT: control target
= control target key end

     0   :  { %vm39_vm0 = vcmask 130048   ;;  %v35_v5 = vlaneseq  ;;  %v1630_v22 = vmov 0.0|0.0   ;;  %vm1631_vm1 = vmmov 0   ;;  %s1963_s1 = inlined_call_operand.vmem [shape: f32[16,96], index: 1, kind: input, shape index: {}]   ;;  %s1964_s0 = inlined_call_operand.vmem [shape: f32[1,64,16], index: 0, kind: input, shape index: {}]   ;;  %s1965_s4 = inlined_call_operand.vmem [shape: f32[8,128], index: 4, kind: input, shape index: {}]   ;;  %s1966_s2 = inlined_call_operand.vmem [shape: f32[32,96], index: 2, kind: input, shape index: {}]   ;;  %s1967_s3 = inlined_call_operand.vmem [shape: f32[64,4], index: 3, kind: input, shape index: {}]   ;;  %s1968_s5 = inlined_call_operand.vmem [shape: f32[8,4], index: 5, kind: output, shape index: {}]  }
   0x1   :  { %v33_v0 = vld [vmem:[%s1963_s1] sm:$0xff]  ;;  %v34_v1 = vld [vmem:[%s1963_s1 + $0x8] sm:$0xff]  ;;  %1492 = vmatprep.subr.bf16.mxu1 %v1630_v22  ;;  %v23_v25 = vld [vmem:[%s1966_s2 + $0x10] sm:$0xff]  ;;  %v1632_v26 = vmov 0.0   ;;  %vm205_vm2 = vcmask 261120   ;;  %vm1287_vm3 = vcmask 31744  }
   0x2   :  { %v25_v2 = vld [vmem:[%s1964_s0] sm:$0xff]  ;;  %v1488_v3 = vpack.c.bf16 %v34_v1, %v33_v0  ;;  %v26_v4 = vld [vmem:[%s1964_s0 + $0x8] sm:$0xff]  ;;  %v1680_v6 = vshrl.u32 %v35_v5, 7  ;;  %1397 = vmatprep.mubr.msk.f32.mxu1 %vm1631_vm1, %v1632_v26  ;;  %v24_v28 = vld [vmem:[%s1966_s2 + $0x18] sm:$0xff] }
   0x3   :  { %1377 = vmatprep.mubr.msk.f32.mxu0 %vm39_vm0, %v25_v2  ;;  %v1686_v8 = vld [vmem:[%s1965_s4] sm:$0xff]  ;;  %s1629_s4 = smov 64   ;;  %v22_v24 = vld [vmem:[%s1966_s2 + $0x8] sm:$0xff]  ;;  %v1714_v29 = vpack.c.bf16 %v24_v28, %v23_v25  ;;  %v27_v49 = vld [vmem:[%s1964_s0 + $0x10] sm:$0xff] }
   0x4   :  { %1489 = vmatprep.subr.bf16.mxu0 %v1488_v3  ;;  %v37_v7 = vsub.s32 0, %v1680_v6  ;;  %v177_v16 = vsub.s32 1, %v1680_v6  ;;  %v21_v23 = vld [vmem:[%s1966_s2] sm:$0xff]  ;;  %s1633_s2 = smov 96   ;;  %v28_v50 = vld [vmem:[%s1964_s0 + $0x18] sm:$0xff] }
   0x5   :  { %1491 = vmatpush3.bf16.msra.mxu0 %v1488_v3  ;;  %v1707_v27 = vpack.c.bf16 %v22_v24, %v21_v23 }
   0x6   :  { %v1689_v9 = vrot.slane %v1686_v8, %v37_v7  ;;  %v178_v17 = vrot.slane %v1686_v8, %v177_v16  ;;  %1504 = vmatprep.subr.bf16.mxu0 %v1630_v22 }
   0x7   :  { %1494 = vmatpush3.bf16.msra.mxu1 %v1707_v27 }
   0x8   :  { %1378 = vmatmul.mubr.msk.f32.vlgmr.msra.gmra.mrb[0].mxu0 %vm39_vm0, %v26_v4  ;;  %1495 = vmatprep.subr.bf16.mxu1 %v1630_v22 }
   0x9   :  { %1506 = vmatpush3.bf16.msra.mxu0 %v1707_v27  ;;  %1380 = vmatprep.mubr.msk.f32.mxu0 %vm39_vm0, %v27_v49 }
   0xa   :  { %1507 = vmatprep.subr.bf16.mxu0 %v1630_v22 }
   0xb   :  { %1497 = vmatpush3.bf16.msra.mxu1 %v1714_v29 }
   0xc   :  { %1498 = vmatprep.subr.bf16.mxu1 %v1630_v22  ;;  %1381 = vmatmul.mubr.msk.f32.gmra.mrb[2].mxu0 %vm39_vm0, %v28_v50 }
   0xd   :  { %1509 = vmatpush3.bf16.msra.mxu0 %v1714_v29 }
   0xe   :  { %1516 = vmatprep.subr.bf16.mxu0 %v1630_v22 }
  0xdb   :  { %v1379_v10 = vpop.f32.mrb[0].mxu0 }
  0xdc   :  { %v130_v11 = vpop.f32.mrb[1].mxu0  ;;  %v136_v39 = vadd.f32 %v1379_v10, %v1689_v9 }
  0xdd   :  { %v131_v12 = vadd.f32 %v130_v11, %v1689_v9 }
  0xdf   :  { %v1301_v13 = vmul.f32 -1.442695, %v131_v12  ;;  %v1382_v57 = vpop.f32.mrb[2].mxu0 }
  0xe0   :  { %v140_v58 = vpop.f32.mrb[3].mxu0 }
  0xe1   :  { %1555 = vpow2.f32 %v1301_v13  ;;  %v141_v63 = vadd.f32 %v140_v58, %v1689_v9  ;;  %v30_v13 = vld [vmem:[%s1964_s0 + $0x28] sm:$0xff] }
  0xeb   :  { %v1556_v14 = vpop.eup %1555 }
  0xec   :  { %v172_v15 = vadd.f32 1.0, %v1556_v14  ;;  %v31_v14 = vld [vmem:[%s1964_s0 + $0x30] sm:$0xff] }
  0xee   :  { %1557 = vrcp.f32 %v172_v15  ;;  %v32_v15 = vld [vmem:[%s1964_s0 + $0x38] sm:$0xff] }
  0xf8   :  { %v1558_v18 = vpop.eup %1557 }
  0xf9   :  { %v179_v19 = vmul.f32 %v1558_v18, %v178_v17  ;;  %v186_v31 = vsub.f32 1.0, %v1558_v18 }
  0xfb   :  { %181 = vrot.lane.b32.xlu0 %v179_v19, %s1629_s4 }
 0x16d   :  { %v182_v20 = vpop.permute.xlu0 %181 }
 0x16e   :  { %v184_v21 = vadd.f32 %v182_v20, %v131_v12  ;;  %v29_v12 = vld [vmem:[%s1964_s0 + $0x20] sm:$0xff]  ;;  %s1634_s0 = smov 32  }
 0x16f   :  { %1383 = vmatprep.mubr.msk.f32.mxu0 %vm39_vm0, %v29_v12 }
 0x170   :  { %1559 = vtanh.f32 %v184_v21  ;;  %1384 = vmatmul.mubr.msk.f32.gmra.mrb[4].mxu0 %vm39_vm0, %v30_v13 }
 0x171   :  { %1386 = vmatprep.mubr.msk.f32.mxu0 %vm39_vm0, %v31_v14 }
 0x174   :  { %1387 = vmatmul.mubr.msk.f32.gmra.mrb[6].mxu0 %vm39_vm0, %v32_v15 }
 0x175   :  { %1419 = vmatprep.mubr.msk.f32.mxu0 %vm1631_vm1, %v1632_v26 }
 0x17a   :  { %v1560_v30 = vpop.eup %1559 }
 0x17b   :  { %188 = vrot.lane.b32.xlu0 %v1560_v30, %s1633_s2 }
 0x1ed   :  { %v189_v32 = vpop.permute.xlu0 %188 }
 0x1ee   :  { %v1724_v33 = vmul.f32 %v189_v32, %v186_v31 }
 0x1f0   :  { %215 = vrot.lane.b32.xlu1 %v1724_v33, %s1633_s2 }
 0x1f4   :  { %297 = vrot.lane.b32.xlu1 %v178_v17, %s1629_s4 }
 0x243   :  { %v1791_v23 = vpop.f32.mrb[4].mxu0 }
 0x244   :  { %v150_v24 = vpop.f32.mrb[5].mxu0 }
 0x247   :  { %v1793_v25 = vpop.f32.mrb[6].mxu0 }
 0x248   :  { %v1795_v28 = vpop.f32.mrb[7].mxu0 }
 0x262   :  { %v216_v34 = vpop.permute.xlu1 %215 }
 0x263   :  { %1398 = vmatmul.mubr.msk.f32.vlgmr.msra.gmra.mrb[0].mxu1 %vm205_vm2, %v216_v34 }
 0x264   :  { %1500 = vmatpush3.bf16.msra.mxu1 %v1707_v27  ;;  %1408 = vmatprep.mubr.msk.f32.mxu1 %vm1631_vm1, %v1632_v26 }
 0x265   :  { %1501 = vmatprep.subr.bf16.mxu1 %v1630_v22 }
 0x266   :  { %v1736_v35 = vpop.permute.xlu1 %297 }
 0x268   :  { %1503 = vmatpush3.bf16.msra.mxu1 %v1714_v29 }
 0x269   :  { %1510 = vmatprep.subr.bf16.mxu1 %v1630_v22 }
 0x336   :  { %v285_v36 = vpop.f32.mrb[0].mxu1 }
 0x337   :  { %v1399_v37 = vpop.f32.mrb[1].mxu1  ;;  %v300_v38 = vadd.f32 %v1736_v35, %v285_v36  ;;  %v289_v40 = vadd.f32 %v285_v36, %v136_v39  ;;  %v146_v36 = vadd.f32 %v1382_v57, %v1689_v9  ;;  %v151_v57 = vadd.f32 %v150_v24, %v1689_v9 }
 0x339   :  { %302 = vrot.lane.b32.xlu0 %v300_v38, %s1629_s4  ;;  %v1303_v41 = vmul.f32 -1.442695, %v289_v40 }
 0x33b   :  { %1561 = vpow2.f32 %v1303_v41 }
 0x345   :  { %v1562_v42 = vpop.eup %1561 }
 0x346   :  { %v293_v43 = vadd.f32 1.0, %v1562_v42 }
 0x348   :  { %1563 = vrcp.f32 %v293_v43 }
 0x352   :  { %v1564_v44 = vpop.eup %1563 }
 0x353   :  { %v312_v52 = vsub.f32 1.0, %v1564_v44  ;;  %v318_v54 = vmul.f32 %v1564_v44, %v1724_v33 }
 0x3ab   :  { %v303_v45 = vpop.permute.xlu0 %302 }
 0x3ac   :  { %v305_v46 = vmul.f32 %v1564_v44, %v303_v45 }
 0x3ae   :  { %307 = vrot.lane.b32.xlu1 %v305_v46, %s1629_s4 }
 0x420   :  { %v308_v47 = vpop.permute.xlu1 %307 }
 0x421   :  { %v310_v48 = vadd.f32 %v308_v47, %v136_v39 }
 0x423   :  { %1565 = vtanh.f32 %v310_v48 }
 0x42d   :  { %v1566_v51 = vpop.eup %1565 }
 0x42e   :  { %314 = vrot.lane.b32.xlu0 %v1566_v51, %s1633_s2 }
 0x4a0   :  { %v315_v53 = vpop.permute.xlu0 %314 }
 0x4a1   :  { %v317_v55 = vmul.f32 %v315_v53, %v312_v52 }
 0x4a3   :  { %v1752_v56 = vadd.f32 %v318_v54, %v317_v55 }
 0x4a5   :  { %351 = vrot.lane.b32.xlu1 %v1752_v56, %s1633_s2 }
 0x517   :  { %v352_v59 = vpop.permute.xlu1 %351 }
 0x518   :  { %1409 = vmatmul.mubr.msk.f32.vlgmr.msra.gmra.mrb[2].mxu1 %vm205_vm2, %v352_v59 }
 0x519   :  { %1512 = vmatpush3.bf16.msra.mxu1 %v1707_v27  ;;  %1430 = vmatprep.mubr.msk.f32.mxu1 %vm1631_vm1, %v1632_v26 }
 0x51a   :  { %1513 = vmatprep.subr.bf16.mxu1 %v1630_v22 }
 0x51d   :  { %1515 = vmatpush3.bf16.msra.mxu1 %v1714_v29 }
 0x51e   :  { %1522 = vmatprep.subr.bf16.mxu1 %v1630_v22 }
 0x5eb   :  { %v421_v60 = vpop.f32.mrb[2].mxu1 }
 0x5ec   :  { %v432_v61 = vadd.f32 %v421_v60, %v1736_v35  ;;  %v1410_v62 = vpop.f32.mrb[3].mxu1  ;;  %v425_v0 = vadd.f32 %v421_v60, %v141_v63 }
 0x5ee   :  { %434 = vrot.lane.b32.xlu0 %v432_v61, %s1629_s4  ;;  %v1305_v1 = vmul.f32 -1.442695, %v425_v0 }
 0x5f0   :  { %1567 = vpow2.f32 %v1305_v1 }
 0x5fa   :  { %v1568_v2 = vpop.eup %1567 }
 0x5fb   :  { %v429_v3 = vadd.f32 1.0, %v1568_v2 }
 0x5fd   :  { %1569 = vrcp.f32 %v429_v3 }
 0x607   :  { %v1570_v4 = vpop.eup %1569 }
 0x608   :  { %v444_v17 = vsub.f32 1.0, %v1570_v4  ;;  %v450_v19 = vmul.f32 %v1570_v4, %v1752_v56 }
 0x660   :  { %v435_v5 = vpop.permute.xlu0 %434 }
 0x661   :  { %v437_v7 = vmul.f32 %v1570_v4, %v435_v5 }
 0x663   :  { %439 = vrot.lane.b32.xlu1 %v437_v7, %s1629_s4 }
 0x6d5   :  { %v440_v10 = vpop.permute.xlu1 %439 }
 0x6d6   :  { %v442_v11 = vadd.f32 %v440_v10, %v141_v63 }
 0x6d8   :  { %1571 = vtanh.f32 %v442_v11 }
 0x6e2   :  { %v1572_v16 = vpop.eup %1571 }
 0x6e3   :  { %446 = vrot.lane.b32.xlu0 %v1572_v16, %s1633_s2  ;;  %v156_v16 = vadd.f32 %v1791_v23, %v1689_v9 }
 0x755   :  { %v447_v18 = vpop.permute.xlu0 %446 }
 0x756   :  { %v449_v20 = vmul.f32 %v447_v18, %v444_v17 }
 0x758   :  { %v1787_v21 = vadd.f32 %v450_v19, %v449_v20 }
 0x75a   :  { %484 = vrot.lane.b32.xlu1 %v1787_v21, %s1633_s2 }
 0x7cc   :  { %v485_v30 = vpop.permute.xlu1 %484 }
 0x7cd   :  { %1420 = vmatmul.mubr.msk.f32.vlgmr.msra.gmra.mrb[8].mxu0 %vm205_vm2, %v485_v30 }
 0x7ce   :  { %1518 = vmatpush3.bf16.msra.mxu0 %v1707_v27  ;;  %1441 = vmatprep.mubr.msk.f32.mxu0 %vm1631_vm1, %v1632_v26 }
 0x7cf   :  { %1519 = vmatprep.subr.bf16.mxu0 %v1630_v22 }
 0x7d2   :  { %1521 = vmatpush3.bf16.msra.mxu0 %v1714_v29 }
 0x7d3   :  { %1528 = vmatprep.subr.bf16.mxu0 %v1630_v22 }
 0x8a0   :  { %v554_v31 = vpop.f32.mrb[8].mxu0 }
 0x8a1   :  { %v565_v32 = vadd.f32 %v554_v31, %v1736_v35  ;;  %v1421_v34 = vpop.f32.mrb[9].mxu0  ;;  %v558_v37 = vadd.f32 %v554_v31, %v146_v36 }
 0x8a3   :  { %567 = vrot.lane.b32.xlu0 %v565_v32, %s1629_s4  ;;  %v1307_v38 = vmul.f32 -1.442695, %v558_v37 }
 0x8a5   :  { %1573 = vpow2.f32 %v1307_v38 }
 0x8af   :  { %v1574_v39 = vpop.eup %1573 }
 0x8b0   :  { %v562_v40 = vadd.f32 1.0, %v1574_v39 }
 0x8b2   :  { %1575 = vrcp.f32 %v562_v40 }
 0x8bc   :  { %v1576_v41 = vpop.eup %1575 }
 0x8bd   :  { %v577_v47 = vsub.f32 1.0, %v1576_v41  ;;  %v583_v49 = vmul.f32 %v1576_v41, %v1787_v21 }
 0x915   :  { %v568_v42 = vpop.permute.xlu0 %567 }
 0x916   :  { %v570_v43 = vmul.f32 %v1576_v41, %v568_v42 }
 0x918   :  { %572 = vrot.lane.b32.xlu1 %v570_v43, %s1629_s4  ;;  %v161_v43 = vadd.f32 %v1795_v28, %v1689_v9 }
 0x98a   :  { %v573_v44 = vpop.permute.xlu1 %572 }
 0x98b   :  { %v575_v45 = vadd.f32 %v573_v44, %v146_v36 }
 0x98d   :  { %1577 = vtanh.f32 %v575_v45 }
 0x997   :  { %v1578_v46 = vpop.eup %1577 }
 0x998   :  { %579 = vrot.lane.b32.xlu0 %v1578_v46, %s1633_s2 }
 0xa0a   :  { %v580_v48 = vpop.permute.xlu0 %579 }
 0xa0b   :  { %v582_v50 = vmul.f32 %v580_v48, %v577_v47 }
 0xa0d   :  { %v1810_v51 = vadd.f32 %v583_v49, %v582_v50 }
 0xa0f   :  { %617 = vrot.lane.b32.xlu1 %v1810_v51, %s1633_s2 }
 0xa81   :  { %v618_v52 = vpop.permute.xlu1 %617 }
 0xa82   :  { %1431 = vmatmul.mubr.msk.f32.vlgmr.msra.gmra.mrb[4].mxu1 %vm205_vm2, %v618_v52 }
 0xa83   :  { %1524 = vmatpush3.bf16.msra.mxu1 %v1707_v27  ;;  %1452 = vmatprep.mubr.msk.f32.mxu1 %vm1631_vm1, %v1632_v26 }
 0xa84   :  { %1525 = vmatprep.subr.bf16.mxu1 %v1630_v22 }
 0xa87   :  { %1527 = vmatpush3.bf16.msra.mxu1 %v1714_v29 }
 0xa88   :  { %1534 = vmatprep.subr.bf16.mxu1 %v1630_v22 }
 0xb55   :  { %v687_v53 = vpop.f32.mrb[4].mxu1 }
 0xb56   :  { %v698_v54 = vadd.f32 %v687_v53, %v1736_v35  ;;  %v1432_v55 = vpop.f32.mrb[5].mxu1  ;;  %v691_v58 = vadd.f32 %v687_v53, %v151_v57 }
 0xb58   :  { %700 = vrot.lane.b32.xlu0 %v698_v54, %s1629_s4  ;;  %v1309_v59 = vmul.f32 -1.442695, %v691_v58  ;;  %v194_v54 = vsub.s32 2, %v1680_v6 }
 0xb5a   :  { %1579 = vpow2.f32 %v1309_v59  ;;  %v195_v28 = vrot.slane %v1686_v8, %v194_v54 }
 0xb64   :  { %v1580_v60 = vpop.eup %1579 }
 0xb65   :  { %v695_v61 = vadd.f32 1.0, %v1580_v60 }
 0xb67   :  { %1581 = vrcp.f32 %v695_v61 }
 0xb71   :  { %v1582_v62 = vpop.eup %1581 }
 0xb72   :  { %v710_v4 = vsub.f32 1.0, %v1582_v62  ;;  %v716_v7 = vmul.f32 %v1582_v62, %v1810_v51 }
 0xbca   :  { %v701_v63 = vpop.permute.xlu0 %700 }
 0xbcb   :  { %v703_v0 = vmul.f32 %v1582_v62, %v701_v63 }
 0xbcd   :  { %705 = vrot.lane.b32.xlu1 %v703_v0, %s1629_s4 }
 0xc3f   :  { %v706_v1 = vpop.permute.xlu1 %705 }
 0xc40   :  { %v708_v2 = vadd.f32 %v706_v1, %v151_v57 }
 0xc42   :  { %1583 = vtanh.f32 %v708_v2 }
 0xc4c   :  { %v1584_v3 = vpop.eup %1583 }
 0xc4d   :  { %712 = vrot.lane.b32.xlu0 %v1584_v3, %s1633_s2 }
 0xcbf   :  { %v713_v5 = vpop.permute.xlu0 %712 }
 0xcc0   :  { %v715_v10 = vmul.f32 %v713_v5, %v710_v4 }
 0xcc2   :  { %v1827_v11 = vadd.f32 %v716_v7, %v715_v10 }
 0xcc4   :  { %750 = vrot.lane.b32.xlu1 %v1827_v11, %s1633_s2 }
 0xd36   :  { %v751_v12 = vpop.permute.xlu1 %750 }
 0xd37   :  { %1442 = vmatmul.mubr.msk.f32.vlgmr.msra.gmra.mrb[10].mxu0 %vm205_vm2, %v751_v12 }
 0xd38   :  { %1530 = vmatpush3.bf16.msra.mxu0 %v1707_v27  ;;  %1463 = vmatprep.mubr.msk.f32.mxu0 %vm1631_vm1, %v1632_v26 }
 0xd39   :  { %1531 = vmatprep.subr.bf16.mxu0 %v1630_v22 }
 0xd3c   :  { %1533 = vmatpush3.bf16.msra.mxu0 %v1714_v29 }
 0xd3d   :  { %1540 = vmatprep.subr.bf16.mxu0 %v1630_v22 }
 0xe0a   :  { %v820_v13 = vpop.f32.mrb[10].mxu0 }
 0xe0b   :  { %v831_v14 = vadd.f32 %v820_v13, %v1736_v35  ;;  %v1443_v15 = vpop.f32.mrb[11].mxu0  ;;  %v824_v17 = vadd.f32 %v820_v13, %v156_v16 }
 0xe0d   :  { %833 = vrot.lane.b32.xlu0 %v831_v14, %s1629_s4  ;;  %v1311_v27 = vmul.f32 -1.442695, %v824_v17 }
 0xe0f   :  { %1585 = vpow2.f32 %v1311_v27 }
 0xe19   :  { %v1586_v18 = vpop.eup %1585 }
 0xe1a   :  { %v828_v19 = vadd.f32 1.0, %v1586_v18 }
 0xe1c   :  { %1587 = vrcp.f32 %v828_v19 }
 0xe26   :  { %v1588_v20 = vpop.eup %1587 }
 0xe27   :  { %v843_v34 = vsub.f32 1.0, %v1588_v20  ;;  %v849_v23 = vmul.f32 %v1588_v20, %v1827_v11 }
 0xe7f   :  { %v834_v24 = vpop.permute.xlu0 %833 }
 0xe80   :  { %v836_v29 = vmul.f32 %v1588_v20, %v834_v24  ;;  %v1635_v24 = vmov 0  }
 0xe81   :  { %1553 = vset.pattern.permute.xlu0 %v1635_v24  ;;  %1554 = vset.pattern.permute.xlu1 %v1635_v24 }
 0xe82   :  { %838 = vrot.lane.b32.xlu1 %v836_v29, %s1629_s4  ;;  %v211_v29 = vsub.s32 3, %v1680_v6 }
 0xef4   :  { %v839_v30 = vpop.permute.xlu1 %838 }
 0xef5   :  { %v841_v31 = vadd.f32 %v839_v30, %v156_v16 }
 0xef7   :  { %1589 = vtanh.f32 %v841_v31  ;;  %v1892_v31 = vrot.slane %v1686_v8, %v211_v29 }
 0xf01   :  { %v1590_v32 = vpop.eup %1589 }
 0xf02   :  { %845 = vrot.lane.b32.xlu0 %v1590_v32, %s1633_s2 }
 0xf74   :  { %v846_v36 = vpop.permute.xlu0 %845 }
 0xf75   :  { %v848_v37 = vmul.f32 %v846_v36, %v843_v34 }
 0xf77   :  { %v1845_v38 = vadd.f32 %v849_v23, %v848_v37 }
 0xf79   :  { %883 = vrot.lane.b32.xlu1 %v1845_v38, %s1633_s2 }
 0xfeb   :  { %v884_v39 = vpop.permute.xlu1 %883 }
 0xfec   :  { %1453 = vmatmul.mubr.msk.f32.vlgmr.msra.gmra.mrb[6].mxu1 %vm205_vm2, %v884_v39 }
 0xfed   :  { %1474 = vmatprep.mubr.msk.f32.mxu1 %vm1631_vm1, %v1632_v26 }
0x10bf   :  { %v953_v40 = vpop.f32.mrb[6].mxu1 }
0x10c0   :  { %v964_v41 = vadd.f32 %v953_v40, %v1736_v35  ;;  %v1454_v42 = vpop.f32.mrb[7].mxu1  ;;  %v957_v44 = vadd.f32 %v953_v40, %v161_v43 }
0x10c2   :  { %966 = vrot.lane.b32.xlu0 %v964_v41, %s1629_s4  ;;  %v1313_v45 = vmul.f32 -1.442695, %v957_v44 }
0x10c4   :  { %1591 = vpow2.f32 %v1313_v45 }
0x10ce   :  { %v1592_v46 = vpop.eup %1591 }
0x10cf   :  { %v961_v47 = vadd.f32 1.0, %v1592_v46 }
0x10d1   :  { %1593 = vrcp.f32 %v961_v47 }
0x10db   :  { %v1594_v48 = vpop.eup %1593 }
0x10dc   :  { %v976_v57 = vsub.f32 1.0, %v1594_v48  ;;  %v982_v59 = vmul.f32 %v1594_v48, %v1845_v38 }
0x1134   :  { %v967_v49 = vpop.permute.xlu0 %966 }
0x1135   :  { %v969_v50 = vmul.f32 %v1594_v48, %v967_v49 }
0x1137   :  { %971 = vrot.lane.b32.xlu1 %v969_v50, %s1629_s4 }
0x11a9   :  { %v972_v52 = vpop.permute.xlu1 %971 }
0x11aa   :  { %v974_v53 = vadd.f32 %v972_v52, %v161_v43 }
0x11ac   :  { %1595 = vtanh.f32 %v974_v53 }
0x11b6   :  { %v1596_v55 = vpop.eup %1595 }
0x11b7   :  { %978 = vrot.lane.b32.xlu0 %v1596_v55, %s1633_s2 }
0x11bb   :  { %197 = vrot.lane.b32.xlu0 %v195_v28, %s1634_s0 }
0x1229   :  { %v979_v58 = vpop.permute.xlu0 %978 }
0x122a   :  { %v981_v60 = vmul.f32 %v979_v58, %v976_v57 }
0x122c   :  { %v1861_v61 = vadd.f32 %v982_v59, %v981_v60 }
0x122d   :  { %v198_v62 = vpop.permute.xlu0 %197 }
0x122e   :  { %1016 = vrot.lane.b32.xlu1 %v1861_v61, %s1633_s2  ;;  %v320_v63 = vmul.f32 %v1752_v56, %v198_v62  ;;  %v200_v0 = vmul.f32 %v198_v62, %v1724_v33  ;;  %v585_v1 = vmul.f32 %v1810_v51, %v198_v62  ;;  %v452_v2 = vmul.f32 %v1787_v21, %v198_v62 }
0x122f   :  { %v851_v3 = vmul.f32 %v1845_v38, %v198_v62  ;;  %v718_v4 = vmul.f32 %v1827_v11, %v198_v62  ;;  %v984_v5 = vmul.f32 %v1861_v61, %v198_v62 }
0x1230   :  { %322 = vrot.lane.b32.xlu0 %v320_v63, %s1633_s2 }
0x1232   :  { %202 = vrot.lane.b32.xlu1 %v200_v0, %s1633_s2 }
0x1234   :  { %587 = vrot.lane.b32.xlu0 %v585_v1, %s1633_s2 }
0x1236   :  { %454 = vrot.lane.b32.xlu1 %v452_v2, %s1633_s2 }
0x1238   :  { %853 = vrot.lane.b32.xlu0 %v851_v3, %s1633_s2 }
0x123a   :  { %720 = vrot.lane.b32.xlu1 %v718_v4, %s1633_s2 }
0x123e   :  { %986 = vrot.lane.b32.xlu1 %v984_v5, %s1633_s2 }
0x12a0   :  { %v1017_v7 = vpop.permute.xlu1 %1016 }
0x12a1   :  { %1464 = vmatmul.mubr.msk.f32.vlgmr.msra.gmra.mrb[12].mxu0 %vm205_vm2, %v1017_v7 }
0x12a2   :  { %v323_v10 = vpop.permute.xlu0 %322  ;;  %1485 = vmatprep.mubr.msk.f32.mxu0 %vm1631_vm1, %v1632_v26 }
0x12a3   :  { %v325_v12 = vsel %vm205_vm2, %v323_v10, 0.0 }
0x12a4   :  { %v203_v13 = vpop.permute.xlu1 %202  ;;  %326 = vadd.xlane.f32.xlu0 %v325_v12 }
0x12a5   :  { %v206_v14 = vsel %vm205_vm2, %v203_v13, 0.0 }
0x12a6   :  { %207 = vadd.xlane.f32.xlu1 %v206_v14  ;;  %v588_v15 = vpop.permute.xlu0 %587 }
0x12a7   :  { %v590_v27 = vsel %vm205_vm2, %v588_v15, 0.0 }
0x12a8   :  { %v455_v16 = vpop.permute.xlu1 %454 }
0x12a9   :  { %v457_v17 = vsel %vm205_vm2, %v455_v16, 0.0 }
0x12aa   :  { %458 = vadd.xlane.f32.xlu0 %v457_v17  ;;  %591 = vadd.xlane.f32.xlu1 %v590_v27  ;;  %v854_v18 = vpop.permute.xlu0 %853 }
0x12ab   :  { %v856_v26 = vsel %vm205_vm2, %v854_v18, 0.0 }
0x12ac   :  { %v721_v19 = vpop.permute.xlu1 %720 }
0x12ad   :  { %v723_v20 = vsel %vm205_vm2, %v721_v19, 0.0 }
0x12ae   :  { %724 = vadd.xlane.f32.xlu0 %v723_v20  ;;  %857 = vadd.xlane.f32.xlu1 %v856_v26 }
0x12b0   :  { %v1889_v30 = vpop.permute.xlu1 %986 }
0x1331   :  { %v327_v32 = vpop.xlane.xlu0 %326 }
0x1332   :  { %v328_v36 = vadd.f32 %v327_v32, %v1892_v31 }
0x1333   :  { %v208_v34 = vpop.xlane.xlu1 %207 }
0x1334   :  { %v213_v23 = vadd.f32 %v1892_v31, %v208_v34 }
0x1336   :  { %v329_v37 = vmax.f32 %v213_v23, %v328_v36 }
0x1337   :  { %v592_v39 = vpop.xlane.xlu1 %591  ;;  %v459_v40 = vpop.xlane.xlu0 %458 }
0x1338   :  { %v330_v41 = vsub.f32 %v213_v23, %v329_v37  ;;  %v333_v42 = vsub.f32 %v328_v36, %v329_v37  ;;  %v460_v43 = vadd.f32 %v459_v40, %v1892_v31  ;;  %v593_v46 = vadd.f32 %v592_v39, %v1892_v31 }
0x133a   :  { %v331_v44 = vmul.f32 1.442695, %v330_v41  ;;  %v334_v45 = vmul.f32 1.442695, %v333_v42  ;;  %v461_v47 = vmax.f32 %v329_v37, %v460_v43 }
0x133b   :  { %v725_v48 = vpop.xlane.xlu0 %724  ;;  %v858_v53 = vpop.xlane.xlu1 %857 }
0x133c   :  { %1597 = vpow2.f32 %v331_v44  ;;  %v462_v49 = vsub.f32 %v329_v37, %v461_v47  ;;  %v465_v50 = vsub.f32 %v460_v43, %v461_v47  ;;  %v594_v52 = vmax.f32 %v461_v47, %v593_v46 }
0x133d   :  { %1599 = vpow2.f32 %v334_v45  ;;  %v726_v54 = vadd.f32 %v725_v48, %v1892_v31  ;;  %v859_v59 = vadd.f32 %v858_v53, %v1892_v31  ;;  %v989_v44 = vsel %vm205_vm2, %v1889_v30, 0.0 }
0x133e   :  { %v463_v55 = vmul.f32 1.442695, %v462_v49  ;;  %v466_v28 = vmul.f32 1.442695, %v465_v50  ;;  %v595_v57 = vsub.f32 %v461_v47, %v594_v52  ;;  %v598_v58 = vsub.f32 %v593_v46, %v594_v52 }
0x133f   :  { %v727_v60 = vmax.f32 %v594_v52, %v726_v54  ;;  %v166_v45 = vadd.f32 %v1793_v25, %v1689_v9 }
0x1340   :  { %1601 = vpow2.f32 %v463_v55  ;;  %v596_v62 = vmul.f32 1.442695, %v595_v57  ;;  %v599_v2 = vmul.f32 1.442695, %v598_v58 }
0x1341   :  { %v728_v63 = vsub.f32 %v594_v52, %v727_v60  ;;  %v731_v0 = vsub.f32 %v726_v54, %v727_v60  ;;  %v1900_v1 = vmax.f32 %v727_v60, %v859_v59  ;;  %1603 = vpow2.f32 %v466_v28 }
0x1342   :  { %1605 = vpow2.f32 %v596_v62 }
0x1343   :  { %v729_v3 = vmul.f32 1.442695, %v728_v63  ;;  %v861_v4 = vsub.f32 %v727_v60, %v1900_v1  ;;  %1607 = vpow2.f32 %v599_v2  ;;  %v732_v7 = vmul.f32 1.442695, %v731_v0  ;;  %v1129_v0 = vld [vmem:[%s1967_s3 + $0x28] sm:$0xff] }
0x1344   :  { %v864_v10 = vsub.f32 %v859_v59, %v1900_v1 }
0x1345   :  { %1609 = vpow2.f32 %v729_v3  ;;  %v862_v13 = vmul.f32 1.442695, %v861_v4  ;;  %v1131_v3 = vld [vmem:[%s1967_s3 + $0x38] sm:$0xff] }
0x1346   :  { %v1598_v5 = vpop.eup %1597  ;;  %1611 = vpow2.f32 %v732_v7  ;;  %v865_v16 = vmul.f32 1.442695, %v864_v10 }
0x1347   :  { %v1600_v12 = vpop.eup %1599  ;;  %1613 = vpow2.f32 %v862_v13 }
0x1348   :  { %v336_v14 = vadd.f32 %v1600_v12, %v1598_v5  ;;  %1615 = vpow2.f32 %v865_v16 }
0x134a   :  { %v1602_v15 = vpop.eup %1601 }
0x134b   :  { %v468_v17 = vmul.f32 %v1602_v15, %v336_v14  ;;  %v1604_v27 = vpop.eup %1603 }
0x134c   :  { %v1606_v19 = vpop.eup %1605 }
0x134d   :  { %v469_v18 = vadd.f32 %v1604_v27, %v468_v17  ;;  %v1608_v26 = vpop.eup %1607 }
0x134f   :  { %v601_v20 = vmul.f32 %v1606_v19, %v469_v18  ;;  %v1610_v29 = vpop.eup %1609 }
0x1350   :  { %v1612_v34 = vpop.eup %1611 }
0x1351   :  { %v602_v24 = vadd.f32 %v1608_v26, %v601_v20  ;;  %v1614_v23 = vpop.eup %1613 }
0x1352   :  { %v1616_v39 = vpop.eup %1615 }
0x1353   :  { %v734_v32 = vmul.f32 %v1610_v29, %v602_v24 }
0x1355   :  { %v735_v36 = vadd.f32 %v1612_v34, %v734_v32 }
0x1357   :  { %v867_v37 = vmul.f32 %v1614_v23, %v735_v36 }
0x1359   :  { %v868_v40 = vadd.f32 %v1616_v39, %v867_v37 }
0x1374   :  { %v1086_v41 = vpop.f32.mrb[12].mxu0 }
0x1375   :  { %v1097_v42 = vadd.f32 %v1086_v41, %v1736_v35  ;;  %v1465_v43 = vpop.f32.mrb[13].mxu0  ;;  %v1090_v46 = vadd.f32 %v1086_v41, %v166_v45 }
0x1377   :  { %1099 = vrot.lane.b32.xlu0 %v1097_v42, %s1629_s4  ;;  %v1315_v47 = vmul.f32 -1.442695, %v1090_v46 }
0x1379   :  { %1617 = vpow2.f32 %v1315_v47 }
0x1383   :  { %v1618_v48 = vpop.eup %1617 }
0x1384   :  { %v1094_v49 = vadd.f32 1.0, %v1618_v48 }
0x1386   :  { %1619 = vrcp.f32 %v1094_v49 }
0x1390   :  { %v1910_v50 = vpop.eup %1619 }
0x1396   :  { %990 = vadd.xlane.f32.xlu0 %v989_v44 }
0x13ac   :  { %339 = vperm.xlu0 %1553, %v1598_v5  }
0x13b0   :  { %871 = vperm.xlu0 %1553, %v1614_v23  }
0x13e9   :  { %v1100_v35 = vpop.permute.xlu0 %1099 }
0x13ea   :  { %v1102_v52 = vmul.f32 %v1910_v50, %v1100_v35 }
0x13ec   :  { %1104 = vrot.lane.b32.xlu1 %v1102_v52, %s1629_s4 }
0x13f0   :  { %345 = vperm.xlu1 %1554, %v1600_v12  }
0x13f4   :  { %472 = vperm.xlu1 %1554, %v1602_v15  }
0x13f8   :  { %478 = vperm.xlu1 %1554, %v1604_v27  }
0x13fc   :  { %605 = vperm.xlu1 %1554, %v1606_v19  }
0x1400   :  { %611 = vperm.xlu1 %1554, %v1608_v26  }
0x1404   :  { %738 = vperm.xlu1 %1554, %v1610_v29  }
0x1408   :  { %744 = vperm.xlu1 %1554, %v1612_v34  }
0x1423   :  { %v991_v9 = vpop.xlane.xlu0 %990 }
0x1424   :  { %v992_v25 = vadd.f32 %v991_v9, %v1892_v31  ;;  %v1128_v31 = vld [vmem:[%s1967_s3 + $0x20] sm:$0xff] }
0x1425   :  { %v1535_v2 = vpack.c.bf16 %v1129_v0, %v1128_v31 }
0x1426   :  { %v993_v30 = vmax.f32 %v1900_v1, %v992_v25 }
0x1427   :  { %1536 = vmatpush3.bf16.msra.mxu1 %v1535_v2 }
0x1428   :  { %v994_v53 = vsub.f32 %v1900_v1, %v993_v30  ;;  %v997_v54 = vsub.f32 %v992_v25, %v993_v30  ;;  %v1130_v1 = vld [vmem:[%s1967_s3 + $0x30] sm:$0xff]  ;;  %1537 = vmatprep.subr.bf16.mxu1 %v1630_v22  ;;  %v1109_v25 = vsub.f32 1.0, %v1910_v50 }
0x1429   :  { %v1538_v4 = vpack.c.bf16 %v1131_v3, %v1130_v1 }
0x142a   :  { %v995_v55 = vmul.f32 1.442695, %v994_v53  ;;  %v998_v28 = vmul.f32 1.442695, %v997_v54 }
0x142b   :  { %1539 = vmatpush3.bf16.msra.mxu1 %v1538_v4  ;;  %v340_v14 = vpop.permute.xlu0 %339 }
0x142c   :  { %1621 = vpow2.f32 %v995_v55  ;;  %v342_v16 = vmul.f32 %v340_v14, %v1724_v33  ;;  %v1124_v33 = vld [vmem:[%s1967_s3] sm:$0xff] }
0x142d   :  { %1623 = vpow2.f32 %v998_v28 }
0x1436   :  { %v1622_v57 = vpop.eup %1621 }
0x1437   :  { %1004 = vperm.xlu0 %1553, %v1622_v57   ;;  %v1000_v58 = vmul.f32 %v1622_v57, %v868_v40  ;;  %v1624_v59 = vpop.eup %1623  ;;  %v872_v40 = vpop.permute.xlu0 %871 }
0x1439   :  { %v1001_v60 = vadd.f32 %v1624_v59, %v1000_v58  ;;  %v1284_v58 = vsub.s32 4, %v1680_v6 }
0x143b   :  { %1119 = vperm.xlu1 %1554, %v1001_v60  }
0x143f   :  { %877 = vperm.xlu1 %1554, %v1616_v39  }
0x1443   :  { %1010 = vperm.xlu1 %1554, %v1624_v59   ;;  %v1285_v59 = vrot.slane %v1686_v8, %v1284_v58 }
0x145e   :  { %v1105_v62 = vpop.permute.xlu1 %1104 }
0x145f   :  { %v1107_v63 = vadd.f32 %v1105_v62, %v166_v45 }
0x1461   :  { %1625 = vtanh.f32 %v1107_v63 }
0x146b   :  { %v1626_v5 = vpop.eup %1625 }
0x146c   :  { %1111 = vrot.lane.b32.xlu0 %v1626_v5, %s1633_s2 }
0x146f   :  { %v346_v7 = vpop.permute.xlu1 %345 }
0x1470   :  { %v348_v15 = vmul.f32 %v346_v7, %v1752_v56  ;;  %v1125_v56 = vld [vmem:[%s1967_s3 + $0x8] sm:$0xff] }
0x1472   :  { %v349_v27 = vadd.f32 %v348_v15, %v342_v16 }
0x1473   :  { %v473_v10 = vpop.permute.xlu1 %472 }
0x1474   :  { %v475_v19 = vmul.f32 %v473_v10, %v349_v27 }
0x1477   :  { %v479_v12 = vpop.permute.xlu1 %478 }
0x1478   :  { %v481_v18 = vmul.f32 %v479_v12, %v1787_v21  ;;  %v1126_v21 = vld [vmem:[%s1967_s3 + $0x10] sm:$0xff] }
0x147a   :  { %v482_v26 = vadd.f32 %v481_v18, %v475_v19 }
0x147b   :  { %v606_v13 = vpop.permute.xlu1 %605 }
0x147c   :  { %v608_v29 = vmul.f32 %v606_v13, %v482_v26 }
0x147f   :  { %v612_v17 = vpop.permute.xlu1 %611 }
0x1480   :  { %v614_v24 = vmul.f32 %v612_v17, %v1810_v51  ;;  %v1541_v51 = vpack.c.bf16 %v1125_v56, %v1124_v33 }
0x1482   :  { %v615_v34 = vadd.f32 %v614_v24, %v608_v29  ;;  %1542 = vmatpush3.bf16.msra.mxu0 %v1541_v51 }
0x1483   :  { %v739_v20 = vpop.permute.xlu1 %738  ;;  %1543 = vmatprep.subr.bf16.mxu0 %v1630_v22 }
0x1484   :  { %v741_v23 = vmul.f32 %v739_v20, %v615_v34 }
0x1487   :  { %v745_v32 = vpop.permute.xlu1 %744 }
0x1488   :  { %v747_v36 = vmul.f32 %v745_v32, %v1827_v11  ;;  %v1127_v11 = vld [vmem:[%s1967_s3 + $0x18] sm:$0xff] }
0x1489   :  { %v1544_v44 = vpack.c.bf16 %v1127_v11, %v1126_v21 }
0x148a   :  { %v748_v39 = vadd.f32 %v747_v36, %v741_v23 }
0x148b   :  { %1545 = vmatpush3.bf16.msra.mxu0 %v1544_v44 }
0x148c   :  { %v874_v42 = vmul.f32 %v872_v40, %v748_v39 }
0x14b6   :  { %v1005_v46 = vpop.permute.xlu0 %1004 }
0x14ba   :  { %v1120_v37 = vpop.permute.xlu1 %1119 }
0x14bb   :  { %1627 = vrcp.f32 %v1120_v37 }
0x14be   :  { %v878_v41 = vpop.permute.xlu1 %877 }
0x14bf   :  { %v880_v43 = vmul.f32 %v878_v41, %v1845_v38  ;;  %v1115_v38 = vmul.f32 %v1910_v50, %v1861_v61 }
0x14c1   :  { %v881_v45 = vadd.f32 %v880_v43, %v874_v42 }
0x14c2   :  { %v1011_v47 = vpop.permute.xlu1 %1010 }
0x14c3   :  { %v1007_v48 = vmul.f32 %v1005_v46, %v881_v45  ;;  %v1013_v49 = vmul.f32 %v1011_v47, %v1861_v61 }
0x14c5   :  { %v1628_v35 = vpop.eup %1627  ;;  %v1014_v52 = vadd.f32 %v1013_v49, %v1007_v48 }
0x14c7   :  { %v1123_v9 = vmul.f32 %v1628_v35, %v1014_v52 }
0x14c9   :  { %1133 = vrot.lane.b32.xlu1 %v1123_v9, %s1633_s2 }
0x14de   :  { %v1112_v30 = vpop.permute.xlu0 %1111 }
0x14df   :  { %v1114_v53 = vmul.f32 %v1112_v30, %v1109_v25 }
0x14e1   :  { %v1116_v22 = vadd.f32 %v1115_v38, %v1114_v53 }
0x14e3   :  { %1208 = vrot.lane.b32.xlu0 %v1116_v22, %s1633_s2 }
0x153b   :  { %v1134_v54 = vpop.permute.xlu1 %1133 }
0x153c   :  { %1475 = vmatmul.mubr.msk.f32.vlgmr.msra.gmra.mrb[8].mxu1 %vm205_vm2, %v1134_v54 }
0x1555   :  { %v1209_v55 = vpop.permute.xlu0 %1208 }
0x1556   :  { %1486 = vmatmul.mubr.msk.f32.vlgmr.msra.gmra.mrb[14].mxu0 %vm205_vm2, %v1209_v55 }
0x160f   :  { %v1203_v28 = vpop.f32.mrb[8].mxu1 }
0x1610   :  { %v1476_v57 = vpop.f32.mrb[9].mxu1 }
0x1629   :  { %v1278_v60 = vpop.f32.mrb[14].mxu0 }
0x162a   :  { %v1279_v62 = vadd.f32 %v1278_v60, %v1203_v28  ;;  %v1487_v63 = vpop.f32.mrb[15].mxu0 }
0x162c   :  { %v1286_v61 = vadd.f32 %v1285_v59, %v1279_v62 }
0x162e   :  { %1288 = vst.msk [vmem:[%s1968_s5] sm:$0xff] %vm1287_vm3, %v1286_v61 }

</bundles_post_ra>
